<compile_context>
chip_gen: v6e
topology: v6e:2x2x1
jax: 0.10.0
libtpu: 0.0.40
codegen_flags: <defaults>
</compile_context>

<pallas_src>
import math
import functools

import jax
import jax.numpy as jnp
from jax.experimental import pallas as pl
from jax.experimental.pallas import tpu as pltpu


# --------------------------------------------------------------------------------------
# Kernel
# --------------------------------------------------------------------------------------
def ets_embed_kernel(pos_ref, x_ref, xprev_ref, w_ref, o_ref, *, compute_dtype):
    # pos_ref:   (TR, 1)   int32, position of each row within its own sequence
    # x_ref:     (TR, C)   current row block
    # xprev_ref: (TR, C)   previous row block (only its last 2 rows are used: causal halo)
    # w_ref:     (3C, Dp)  fused conv weight, taps ordered [l-2 | l-1 | l]
    # o_ref:     (TR, Dp)
    x = x_ref[...]
    xp = xprev_ref[...]
    pos = pos_ref[...]

    rows = x.shape[0]
    r = jax.lax.broadcasted_iota(jnp.int32, (rows, 1), 0)   # row index within this block

    # tap x[l-1]: from this block (r >= 1) or the halo block (r == 0); zero at sequence start.
    x1 = jnp.where(r >= 1, pltpu.roll(x, shift=1, axis=0), pltpu.roll(xp, shift=1, axis=0))
    x1 = jnp.where(pos >= 1, x1, 0.0)
    # tap x[l-2]: from this block (r >= 2) or the halo block (r < 2); zero for pos < 2.
    x2 = jnp.where(r >= 2, pltpu.roll(x, shift=2, axis=0), pltpu.roll(xp, shift=2, axis=0))
    x2 = jnp.where(pos >= 2, x2, 0.0)

    # Single fused MXU matmul: (TR, 3C) @ (3C, Dp), f32 accumulation.
    x_cat = jnp.concatenate([x2, x1, x], axis=1).astype(compute_dtype)
    acc = jnp.dot(x_cat, w_ref[...], preferred_element_type=jnp.float32)

    # TODO(synk): train-mode Dropout(p=0.1) would use pltpu.prng_seed + pltpu.stateful_bernoulli;
    # eval-mode (identity) is implemented here.
    o_ref[...] = acc.astype(o_ref.dtype)


# --------------------------------------------------------------------------------------
# Block sizing / VMEM budgeting
# --------------------------------------------------------------------------------------
def _round_up(a, b):
    return (a + b - 1) // b * b


def _divisors(n):
    ds = set()
    i = 1
    while i * i <= n:
        if n % i == 0:
            ds.add(i)
            ds.add(n // i)
        i += 1
    return sorted(ds)


def _vmem_limit_bytes():
    """Generation-aware VMEM limit: ~48 MiB on v7x-class (64 MiB physical), 64 MiB on v5e/v6e."""
    cap = 64 << 20
    try:
        info = pltpu.get_tpu_info()
        cap = int(getattr(info, "vmem_capacity_bytes", cap))
    except Exception:
        pass
    if cap >= (120 << 20):      # v5e / v6e: 128 MiB physical
        return 64 << 20
    if cap >= (60 << 20):       # v7x-class: 64 MiB physical per TensorCore
        return 48 << 20
    return max(cap // 2, 16 << 20)


def _choose_rows_per_block(total_rows, C, D_pad, in_bytes, out_bytes, compute_bytes,
                           budget_bytes, target_rows=2048):
    """Pick rows per grid step.

    Constraints: rows divides total_rows and is a multiple of 8 (or equals total_rows).
    Preference (per perf review): >= 4 grid steps with an even count (>= 2 per v7x core),
    rows <= ~2048 (mem-bound plateau), and the corrected VMEM accounting fits the budget.
    """
    padC = _round_up(C, 128)
    pad3C = _round_up(3 * C, 128)

    def block_bytes(tr):
        b = 0
        b += 2 * 2 * tr * padC * in_bytes                       # x_cur + x_prev, double-buffered
        b += 2 * tr * 128 * 4                                   # pos (lane-padded i32), double-buffered
        b += 2 * tr * D_pad * out_bytes                         # output block, double-buffered
        b += 2 * _round_up(3 * C, 8) * D_pad * compute_bytes    # resident fused weight (x2, conservative)
        b += 6 * tr * padC * max(in_bytes, 4)                   # rolls / selects temporaries
        b += tr * pad3C * compute_bytes                         # x_cat
        b += tr * D_pad * 4                                     # f32 accumulator
        return b

    valid = [tr for tr in _divisors(total_rows) if tr % 8 == 0 or tr == total_rows]
    if not valid:
        return total_rows
    fitting = [tr for tr in valid if block_bytes(tr) <= budget_bytes]
    if not fitting:
        return min(valid)   # smallest legal block; compiler / vmem_limit has the final say

    def steps(tr):
        return total_rows // tr

    for pred in (lambda tr: steps(tr) >= 4 and steps(tr) % 2 == 0 and tr <= target_rows,
                 lambda tr: steps(tr) >= 4 and tr <= target_rows,
                 lambda tr: steps(tr) >= 2 and tr <= target_rows):
        cands = [tr for tr in fitting if pred(tr)]
        if cands:
            return max(cands)
    return min(fitting, key=lambda tr: abs(tr - target_rows))


# --------------------------------------------------------------------------------------
# Wrapper
# --------------------------------------------------------------------------------------
def ets_embedding(x, w_dck, *, out_dtype=jnp.bfloat16, compute_dtype=jnp.bfloat16,
                  target_rows=2048):
    """ETSEmbedding forward (eval mode).

    x:     (B, L, C_in)        channels-last input.
    w_dck: (D_model, C_in, 3)  Conv1d weight in PyTorch layout.
    Returns (B, L, D_model) in `out_dtype`.  bf16 output/compute is the performance default
    (output write-back dominates HBM traffic); pass out_dtype=compute_dtype=jnp.float32 for
    exact PyTorch f32 Conv1d numerics.
    """
    B, L, C = x.shape
    D, C2, K = w_dck.shape
    assert K == 3 and C2 == C

    total_rows = B * L
    D_pad = _round_up(D, 128)   # lane-dense output -> unmasked vst

    # Fused weight (3C, Dp): rows ordered [tap l-2 | tap l-1 | tap l] x channels.
    w2d = jnp.transpose(w_dck, (2, 1, 0)).reshape(3 * C, D)
    if D_pad != D:
        w2d = jnp.pad(w2d, ((0, 0), (0, D_pad - D)))
    w2d = w2d.astype(compute_dtype)

    x2d = x.reshape(total_rows, C)
    # Precomputed per-row sequence position (replaces per-step iota + modulo in the kernel).
    pos2d = (jnp.arange(total_rows, dtype=jnp.int32) % L).reshape(total_rows, 1)

    vmem_limit = _vmem_limit_bytes()
    tr = _choose_rows_per_block(
        total_rows, C, D_pad,
        jnp.dtype(x.dtype).itemsize, jnp.dtype(out_dtype).itemsize,
        jnp.dtype(compute_dtype).itemsize,
        budget_bytes=(3 * vmem_limit) // 4, target_rows=target_rows)
    grid = (total_rows // tr,)

    kernel = functools.partial(ets_embed_kernel, compute_dtype=compute_dtype)

    out2d = pl.pallas_call(
        kernel,
        out_shape=jax.ShapeDtypeStruct((total_rows, D_pad), out_dtype),
        grid_spec=pltpu.PrefetchScalarGridSpec(
            num_scalar_prefetch=0,
            grid=grid,
            in_specs=[
                # Per-row sequence position (tiny).
                pl.BlockSpec((tr, 1), lambda i: (i, 0)),
                # Current row block of x.
                pl.BlockSpec((tr, C), lambda i: (i, 0)),
                # Previous row block (2-row causal halo; block 0 clamps to itself, masked).
                pl.BlockSpec((tr, C), lambda i: (jnp.maximum(i - 1, 0), 0)),
                # Fused weight with a constant index map -> stays resident in VMEM.
                pl.BlockSpec((3 * C, D_pad), lambda i: (0, 0)),
            ],
            # Lane-dense output slab (D_pad is a multiple of 128).
            out_specs=pl.BlockSpec((tr, D_pad), lambda i: (i, 0)),
        ),
        compiler_params=pltpu.CompilerParams(
            dimension_semantics=("parallel",),
            vmem_limit_bytes=vmem_limit,
        ),
    )(pos2d, x2d, x2d, w2d)

    if D_pad != D:
        out2d = out2d[:, :D]
    return out2d.reshape(B, L, D)


# --------------------------------------------------------------------------------------
# Pure-JAX reference (mirrors PyTorch causal Conv1d semantics), weight in torch (D, C, K).
# --------------------------------------------------------------------------------------
def ets_embedding_ref(x, w_dck):
    B, L, C = x.shape
    xp = jnp.pad(x, ((0, 0), (2, 0), (0, 0)))                  # left-pad the sequence by 2
    out = jnp.zeros((B, L, w_dck.shape[0]), jnp.float32)
    for k in range(3):
        out = out + jnp.einsum("blc,dc->bld", xp[:, k:k + L], w_dck[:, :, k])
    return out


if __name__ == "__main__":
    key = jax.random.PRNGKey(0)

    configs = [
        (4, 16, 4, 128),   # lane-dense d_model (multiple of 128)
        (2, 16, 7, 96),    # odd c_in + non-128 d_model (exercises the padding / halo paths)
    ]
    for (B, L, C_IN, D_MODEL) in configs:
        key, kx, kw = jax.random.split(key, 3)
        x = jax.random.normal(kx, (B, L, C_IN), dtype=jnp.float32)

        # Kaiming-normal init of the Conv1d weight in torch layout (D, C, K):
        fan_in = C_IN * 3
        w_torch = jax.random.normal(kw, (D_MODEL, C_IN, 3), dtype=jnp.float32) * math.sqrt(2.0 / fan_in)

        ref = ets_embedding_ref(x, w_torch)

        # Performance default: bf16 matmul operands + bf16 output (f32 MXU accumulation).
        out = jax.block_until_ready(ets_embedding(x, w_torch))
        assert out.shape == (B, L, D_MODEL)
        assert out.dtype == jnp.bfloat16
        assert jnp.allclose(out.astype(jnp.float32), ref, atol=5e-2, rtol=5e-2), \
            f"bf16 path mismatch for config {(B, L, C_IN, D_MODEL)}"

        # Exact-numerics path mirroring the PyTorch f32 Conv1d.
        out_f32 = jax.block_until_ready(
            ets_embedding(x, w_torch, out_dtype=jnp.float32, compute_dtype=jnp.float32))
        assert out_f32.dtype == jnp.float32
        assert jnp.allclose(out_f32, ref, atol=1e-5, rtol=1e-5), \
            f"f32 path mismatch for config {(B, L, C_IN, D_MODEL)}"

    print("KERNEL_OK")
</pallas_src>

<mosaic_0001>
module attributes {stable_mosaic.version = 11 : i64} {
  func.func @ets_embed_kernel(%arg0: i32, %arg1: memref<16x1xi32, #tpu.memory_space<vmem>>, %arg2: memref<16x4xf32, #tpu.memory_space<vmem>>, %arg3: memref<16x4xf32, #tpu.memory_space<vmem>>, %arg4: memref<12x128xbf16, #tpu.memory_space<vmem>>, %arg5: memref<16x128xbf16, #tpu.memory_space<vmem>>) attributes {dimension_semantics = [#tpu.dimension_semantics<parallel>], iteration_bounds = array<i64: 4>, scalar_prefetch = 0 : i64, scratch_operands = 0 : i64, tpu.core_type = #tpu.core_type<tc>, window_params = [{transform_indices = @transform_0, window_bounds = array<i64: 16, 1>}, {transform_indices = @transform_1, window_bounds = array<i64: 16, 4>}, {transform_indices = @transform_2, window_bounds = array<i64: 16, 4>}, {pipeline_mode = #tpu.pipeline_mode<synchronous>, transform_indices = @transform_3, window_bounds = array<i64: 12, 128>}, {transform_indices = @transform_4, window_bounds = array<i64: 16, 128>}]} {
    %c0 = arith.constant 0 : index
    %c0_0 = arith.constant 0 : index
    %0 = vector.load %arg2[%c0, %c0_0] : memref<16x4xf32, #tpu.memory_space<vmem>>, vector<16x4xf32>
    %c0_1 = arith.constant 0 : index
    %c0_2 = arith.constant 0 : index
    %1 = vector.load %arg3[%c0_1, %c0_2] : memref<16x4xf32, #tpu.memory_space<vmem>>, vector<16x4xf32>
    %c0_3 = arith.constant 0 : index
    %c0_4 = arith.constant 0 : index
    %2 = vector.load %arg1[%c0_3, %c0_4] : memref<16x1xi32, #tpu.memory_space<vmem>>, vector<16x1xi32>
    %3 = tpu.iota {dimensions = array<i32: 0>} : vector<16x1xi32>
    %c1_i32 = arith.constant 1 : i32
    %4 = vector.broadcast %c1_i32 : i32 to vector<16x1xi32>
    %5 = arith.cmpi sge, %3, %4 : vector<16x1xi32>
    %c1_i32_5 = arith.constant 1 : i32
    %6 = tpu.dynamic_rotate %0 by %c1_i32_5 dim 0 : vector<16x4xf32>, i32 -> vector<16x4xf32>
    %c1_i32_6 = arith.constant 1 : i32
    %7 = tpu.dynamic_rotate %1 by %c1_i32_6 dim 0 : vector<16x4xf32>, i32 -> vector<16x4xf32>
    %8 = vector.shape_cast %5 : vector<16x1xi1> to vector<16x1xi1>
    %9 = vector.broadcast %8 : vector<16x1xi1> to vector<16x4xi1>
    %10 = arith.select %9, %6, %7 : vector<16x4xi1>, vector<16x4xf32>
    %c1_i32_7 = arith.constant 1 : i32
    %11 = vector.broadcast %c1_i32_7 : i32 to vector<16x1xi32>
    %12 = arith.cmpi sge, %2, %11 : vector<16x1xi32>
    %cst = arith.constant 0.000000e+00 : f32
    %13 = vector.shape_cast %12 : vector<16x1xi1> to vector<16x1xi1>
    %14 = vector.broadcast %13 : vector<16x1xi1> to vector<16x4xi1>
    %15 = vector.broadcast %cst : f32 to vector<16x4xf32>
    %16 = arith.select %14, %10, %15 : vector<16x4xi1>, vector<16x4xf32>
    %c2_i32 = arith.constant 2 : i32
    %17 = vector.broadcast %c2_i32 : i32 to vector<16x1xi32>
    %18 = arith.cmpi sge, %3, %17 : vector<16x1xi32>
    %c2_i32_8 = arith.constant 2 : i32
    %19 = tpu.dynamic_rotate %0 by %c2_i32_8 dim 0 : vector<16x4xf32>, i32 -> vector<16x4xf32>
    %c2_i32_9 = arith.constant 2 : i32
    %20 = tpu.dynamic_rotate %1 by %c2_i32_9 dim 0 : vector<16x4xf32>, i32 -> vector<16x4xf32>
    %21 = vector.shape_cast %18 : vector<16x1xi1> to vector<16x1xi1>
    %22 = vector.broadcast %21 : vector<16x1xi1> to vector<16x4xi1>
    %23 = arith.select %22, %19, %20 : vector<16x4xi1>, vector<16x4xf32>
    %c2_i32_10 = arith.constant 2 : i32
    %24 = vector.broadcast %c2_i32_10 : i32 to vector<16x1xi32>
    %25 = arith.cmpi sge, %2, %24 : vector<16x1xi32>
    %cst_11 = arith.constant 0.000000e+00 : f32
    %26 = vector.shape_cast %25 : vector<16x1xi1> to vector<16x1xi1>
    %27 = vector.broadcast %26 : vector<16x1xi1> to vector<16x4xi1>
    %28 = vector.broadcast %cst_11 : f32 to vector<16x4xf32>
    %29 = arith.select %27, %23, %28 : vector<16x4xi1>, vector<16x4xf32>
    %30 = tpu.concatenate %29, %16, %0 in 1 : vector<16x4xf32>, vector<16x4xf32>, vector<16x4xf32> -> vector<16x12xf32>
    %31 = arith.truncf %30 : vector<16x12xf32> to vector<16x12xbf16>
    %c0_12 = arith.constant 0 : index
    %c0_13 = arith.constant 0 : index
    %32 = vector.load %arg4[%c0_12, %c0_13] : memref<12x128xbf16, #tpu.memory_space<vmem>>, vector<12x128xbf16>
    %cst_14 = arith.constant dense<0.000000e+00> : vector<16x128xf32>
    %33 = tpu.matmul %31, %32, %cst_14 {dimension_numbers = #tpu.dot_dimension_numbers<[1], [0], [0], [1], [0, 0, 1, 1], [], []>} : vector<16x12xbf16>, vector<12x128xbf16>, vector<16x128xf32> -> vector<16x128xf32>
    %34 = arith.truncf %33 : vector<16x128xf32> to vector<16x128xbf16>
    %c0_15 = arith.constant 0 : index
    %c0_16 = arith.constant 0 : index
    %35 = vector.load %arg5[%c0_15, %c0_16] : memref<16x128xbf16, #tpu.memory_space<vmem>>, vector<16x128xbf16>
    tpu.vector_store %arg5[%c0_15, %c0_16], %34 {strides = array<i32>} : memref<16x128xbf16, #tpu.memory_space<vmem>>, vector<16x128xbf16>,
    return
  }
  func.func @transform_0(%arg0: i32) -> (i32, i32) {
    %c0_i32 = arith.constant 0 : i32
    %c0_i32_0 = arith.constant 0 : i32
    return %arg0, %c0_i32 : i32, i32
  }
  func.func @transform_1(%arg0: i32) -> (i32, i32) {
    %c0_i32 = arith.constant 0 : i32
    %c0_i32_0 = arith.constant 0 : i32
    return %arg0, %c0_i32 : i32, i32
  }
  func.func @transform_2(%arg0: i32) -> (i32, i32) {
    %c1_i32 = arith.constant 1 : i32
    %0 = arith.subi %arg0, %c1_i32 : i32
    %c0_i32 = arith.constant 0 : i32
    %1 = arith.maxsi %0, %c0_i32 : i32
    %c0_i32_0 = arith.constant 0 : i32
    %c0_i32_1 = arith.constant 0 : i32
    return %1, %c0_i32_0 : i32, i32
  }
  func.func @transform_3(%arg0: i32) -> (i32, i32) {
    %c0_i32 = arith.constant 0 : i32
    %c0_i32_0 = arith.constant 0 : i32
    %c0_i32_1 = arith.constant 0 : i32
    return %c0_i32, %c0_i32_0 : i32, i32
  }
  func.func @transform_4(%arg0: i32) -> (i32, i32) {
    %c0_i32 = arith.constant 0 : i32
    %c0_i32_0 = arith.constant 0 : i32
    return %arg0, %c0_i32 : i32, i32
  }
}

</mosaic_0001>

<bundles_post_ra>
// kernel: tpu_custom_call.1
= control target key start
LH: loop header
LB: loop body
LE: loop exit
PB: predicated region body
PF: predicated region fallthrough
CT: control target
= control target key end

     0   :  { %9 = vsyncpa [#allocation3], 0  ;;  %s832_s0 = inlined_call_operand.vmem [shape: s32[64,1], index: 0, kind: input, shape index: {}]   ;;  %s833_s1 = inlined_call_operand.vmem [shape: f32[64,4], index: 1, kind: input, shape index: {}]   ;;  %s834_s2 = inlined_call_operand.vmem [shape: f32[64,4], index: 2, kind: input, shape index: {}]   ;;  %s835_s3 = inlined_call_operand.vmem [shape: bf16[12,128], index: 3, kind: input, shape index: {}]   ;;  %s836_s4 = inlined_call_operand.hbm [shape: bf16[64,128], index: 4, kind: output, shape index: {}]  }
   0x1   :  { %11 = vsyncpa [#allocation3 + $0x1], 0  ;;  %s716_s15 = smov 0   ;;  %s718_s16 = smov 0  }
   0x2   :  { %s720_s17 = smov 0   ;;  %s722_s18 = smov 0  }
   0x3 LB: > { %s737_s19 = sadd.s32 4294967295, %s682_s18   ;;  %s525_s20 = sadd.s32 4294967294, %s682_s18   ;;  %s682_s18 = sphi %s722_s18, %s842_s18   ;;  %s678_s17 = sphi %s720_s17, %s841_s17   ;;  %s674_s16 = sphi %s718_s16, %s840_s16   ;;  %s670_s15 = sphi %s716_s15, %s839_s15  }
   0x4   : > { %s741_s21 = sadd.s32 1, %s682_s18   ;;  %s129_s22 = sadd.s32 1, %s678_s17 }
   0x5   : > { %s126_s23 = ssub.s32 %s682_s18, %s741_s21  ;;  %p139_p0 = scmp.ne.s32.totalorder %s678_s17, %s674_s16 }
   0x6   : > { %p127_p1 = scmp.eq.s32.totalorder %s126_s23, 0  ;;  %p140_p2 = scmp.eq.s32.totalorder %s737_s19, 3 }
   0x7   : > { %p145_p3 = scmp.ne.s32.totalorder %s674_s16, %s670_s15  ;;  %p146_p4 = scmp.eq.s32.totalorder %s525_s20, 3 }
   0x8   : > { %s752_s24 = scalar_select %p127_p1, %s678_s17, %s129_s22  }
   0x9   : > { %p754_p5 = por %p140_p2, %p139_p0  ;;  %p758_p6 = por %p146_p4, %p145_p3 }
   0xa   : > { %p530_p7 = scmp.ge.s32.totalorder %s682_s18, 1  ;;  %p200_p8 = scmp.lt.s32.totalorder %s682_s18, 5 }
   0xc   : > { %p201_p9 = pnand %p530_p7, %p200_p8 }
   0xd   : > { %s532_s27 = sshll.u32 (!%p201_p9), %s737_s19, 1  ;;  %s536_s28 = sadd.s32 (!%p201_p9), 4294967295, %s737_s19 }
   0xe   : > { %204 = sbr.rel (%p201_p9) target bundleno = 492 (0x1ec), region = 36  ;;  %p240_p10 = scmp.lt.s32.totalorder (!%p201_p9), %s532_s27, 7 }
   0xf   : > { %p252_p11 = scmp.gt.s32.totalorder (!%p201_p9), %s536_s28, 0  ;;  %s685_s20 = smov (!%p201_p9), 8  }
  0x13   : > { %v271_v0 = vlaneseq  ;;  %v684_v1 = vmov 0   ;;  %s844_s27 = smov (!%p240_p10, %s532_s27), 7  ;;  %s846_s28 = smov (!%p252_p11, %s536_s28), 0  ;;  %v621_v28 = vld [vmem:[%s835_s3] sm:$0x3f]   ;;  %vm370_vm7 = vcmask 1045504  }
  0x14   : > { %609 = vset.pattern.permute.xlu0 %v684_v1  ;;  %610 = vset.pattern.permute.xlu1 %v684_v1  ;;  %s533_s29 = sshll.u32 %s844_s27, 3  ;;  %s537_s10 = sshll.u32 %s846_s28, 1  ;;  %v686_v29 = vmov 0.0   ;;  %v372_v30 = vsel %vm370_vm7, %v621_v28, 0  ;;  %vm687_vm9 = vmmov 0   ;;  %vm352_vm14 = vcmask 31744  }
  0x15   : > { %v272_v2 = vshrl.u32 %v271_v0, 7  ;;  %s243_s6 = scalar_lea.vmem %s832_s0, %s533_s29  ;;  %s249_s9 = scalar_lea.vmem %s833_s1, %s533_s29  ;;  %558 = vmatprep.subr.bf16.mxu0 %v686_v29  ;;  %560 = vmatprep.mubr.msk.bf16.mxu0 %vm687_vm9, %v686_v29  ;;  %vm355_vm15 = vcmask 64512  }
  0x16   : > { %v265_v3 = vld [vmem:[%s249_s9] sm:$0xff]  ;;  %v266_v4 = vld [vmem:[%s249_s9 + $0x8] sm:$0xff]  ;;  %p255_p12 = scmp.lt.s32.totalorder %s537_s10, 7  ;;  %559 = vmatpush3.bf16.msra.mxu0 %v372_v30  ;;  %s688_s27 = smov 4  }
  0x17   : > { %v269_v5 = vld [vmem:[%s243_s6] sm:$0xff]  ;;  %vm278_vm0 = vcmp.lt.s32.totalorder %v272_v2, 1  ;;  %v276_v6 = vrot.slane %v265_v3, 7  ;;  %v277_v7 = vrot.slane %v266_v4, 7  ;;  %v270_v8 = vld [vmem:[%s243_s6 + $0x8] sm:$0xff]  ;;  %v307_v12 = vrot.slane %v265_v3, 6 }
  0x18   : > { %vm291_vm1 = vcmp.ge.s32.totalorder %v269_v5, 1  ;;  %vm292_vm2 = vcmp.ge.s32.totalorder %v270_v8, 1  ;;  %vm322_vm3 = vcmp.ge.s32.totalorder %v269_v5, 2  ;;  %vm323_vm4 = vcmp.ge.s32.totalorder %v270_v8, 2  ;;  %s848_s10 = smov (!%p255_p12, %s537_s10), 7  ;;  %s236_s28 = sand.u32 1, %s674_s16  }
  0x19   : > { %v293_v9 = vsel %vm291_vm1, 1, %v684_v1  ;;  %v324_v10 = vsel %vm322_vm3, 1, %v684_v1  ;;  %v280_v11 = vsel %vm278_vm0, %v277_v7, %v276_v6  ;;  %v308_v13 = vrot.slane %v266_v4, 6  ;;  %s538_s11 = sshll.u32 %s848_s10, 3  ;;  %s531_s29 = sshll.u32 %s236_s28, 3 }
  0x1a   : > { %296 = vperm.xlu0 %609, %v293_v9   ;;  %v294_v14 = vsel %vm292_vm2, 1, %v684_v1  ;;  %327 = vperm.xlu1 %610, %v324_v10   ;;  %v279_v15 = vsel %vm278_vm0, %v276_v6, %v277_v7  ;;  %v325_v16 = vsel %vm323_vm4, 1, %v684_v1  ;;  %s258_s14 = scalar_lea.vmem %s834_s2, %s538_s11  ;;  %vm309_vm5 = vcmp.lt.s32.totalorder %v272_v2, 2  ;;  %s238_s30 = scalar_lea.vmem [#allocation2], %s531_s29 }
  0x1b   : > { %v267_v17 = vld [vmem:[%s258_s14] sm:$0xff]  ;;  %v268_v18 = vld [vmem:[%s258_s14 + $0x8] sm:$0xff]  ;;  %v616_v19 = vpack.i.bf16 %v266_v4, %v265_v3  ;;  %v311_v20 = vsel %vm309_vm5, %v308_v13, %v307_v12  ;;  %vm305_vm6 = vcmp.ge.s32.totalorder %v272_v2, 2  ;;  %v310_v23 = vsel %vm309_vm5, %v307_v12, %v308_v13  ;;  %s439_s5 = sshll.u32 %s238_s30, 4  ;;  %s550_s6 = sshll.u32 %s737_s19, 7  ;;  %s784_s5 = int_to_ptr.vmem [resolvable:$true] %s439_s5 }
  0x1c   : > { %v312_v21 = vrot.slane %v267_v17, 6  ;;  %v313_v22 = vrot.slane %v268_v18, 6  ;;  %v281_v26 = vrot.slane %v267_v17, 7  ;;  %v282_v27 = vrot.slane %v268_v18, 7  ;;  %s789_s9 = scalar_lea.hbm %s836_s4, %s550_s6  ;;  %s791_s10 = scalar_lea.sflag [#allocation3], %s236_s28 }
  0x1d   : > { %vm274_vm8 = vcmp.ge.s32.totalorder %v272_v2, 1  ;;  %s622_s11 = scalar_lea.vmem %s784_s5, 128  ;;  %s689_s19 = smov [#allocation2]  }
  0x1e   : > { %299 = vperm.xlu0 %609, %v294_v14   ;;  %330 = vperm.xlu1 %610, %v325_v16   ;;  %v315_v24 = vsel %vm309_vm5, %v313_v22, %v312_v21  ;;  %v284_v31 = vsel %vm278_vm0, %v282_v27, %v281_v26  ;;  %vm366_vm0 = vcmask 97280   ;;  %p623_p13 = scmp.ne.s32.totalorder %s784_s5, %s622_s11  ;;  %s626_s12 = sshll.u32 %s689_s19, 4  ;;  %s627_s12 = int_to_ptr.vmem [resolvable:$false] %s626_s12 }
  0x1f   : > { %v320_v25 = vsel %vm305_vm6, %v311_v20, %v315_v24  ;;  %v289_v33 = vsel %vm274_vm8, %v280_v11, %v284_v31  ;;  %s628_s13 = scalar_lea.vmem %s627_s12, 256  ;;  %p629_p2 = scmp.lt.s32.totalorder %s784_s5, %s627_s12 }
  0x20   : > { %p624_p0 = pnand %p623_p13, %p754_p5  ;;  %p630_p3 = scmp.lt.s32.totalorder %s628_s13, %s622_s11 }
  0x22   : > { %617 = vrot.lane.b32.xlu1 %v616_v19, %s685_s20  ;;  %p625_p1 = pneg %p624_p0  ;;  %p631_p4 = por %p630_p3, %p629_p2 }
  0x24   : > { %p632_p7 = pnand %p631_p4, %p625_p1 }
  0x95   : > { %v297_v32 = vpop.permute.xlu0 %296  ;;  %v328_v38 = vpop.permute.xlu1 %327 }
  0x96   : > { %vm301_vm10 = vcmp.eq.s32.totalorder %v297_v32, 1  ;;  %vm332_vm12 = vcmp.eq.s32.totalorder %v328_v38, 1 }
  0x97   : > { %v303_v35 = vsel %vm301_vm10, %v289_v33, 0.0  ;;  %v334_v46 = vsel %vm332_vm12, %v320_v25, 0.0 }
  0x99   : > { %v300_v34 = vpop.permute.xlu0 %299  ;;  %v331_v39 = vpop.permute.xlu1 %330 }
  0x9a   : > { %vm302_vm11 = vcmp.eq.s32.totalorder %v300_v34, 1  ;;  %vm333_vm13 = vcmp.eq.s32.totalorder %v331_v39, 1 }
  0x9b   : > { %v304_v36 = vsel %vm302_vm11, %v279_v15, 0.0  ;;  %v335_v47 = vsel %vm333_vm13, %v310_v23, 0.0 }
  0x9c   : > { %v611_v37 = vpack.i.bf16 %v304_v36, %v303_v35 }
  0x9d   : > { %v618_v40 = vpop.permute.xlu1 %617 }
  0x9e   : > { %612 = vrot.lane.b32.xlu0 %v611_v37, %s688_s27  ;;  %v620_v42 = vunpack.i.h.bf16 %v618_v40  ;;  %v619_v43 = vunpack.i.l.bf16 %v618_v40 }
 0x110   : > { %v613_v41 = vpop.permute.xlu0 %612 }
 0x111   : > { %v615_v44 = vunpack.i.h.bf16 %v613_v41  ;;  %v614_v45 = vunpack.i.l.bf16 %v613_v41 }
 0x113   : > { %v354_v48 = vsel %vm352_vm14, %v335_v47, %v615_v44  ;;  %v353_v49 = vsel %vm352_vm14, %v334_v46, %v614_v45 }
 0x114   : > { %v356_v50 = vsel %vm355_vm15, %v353_v49, %v619_v43  ;;  %v357_v51 = vsel %vm355_vm15, %v354_v48, %v620_v42 }
 0x115   : > { %v358_v52 = vpack.c.bf16 %v357_v51, %v356_v50 }
 0x117   : > { %561 = vmatmul.mubr.msk.bf16.vlgmr.msra.gmra.mxu0 %vm366_vm0, %v358_v52 }
 0x1d7   : > { %v408_v53 = vpop.f32.mrf.mxu0 }
 0x1d9   : > { %v562_v54 = vpop.f32.mrf.mxu0 }
 0x1db   : > { %v411_v55 = vpop.f32.mrf.mxu0 }
 0x1dc   : > { %v554_v56 = vpack.c.bf16 %v411_v55, %v408_v53 }
 0x1dd   : > { %v563_v57 = vpop.f32.mrf.mxu0 }
 0x1de   : > { %555 = vst [vmem:[%s238_s30] sm:$0xff] %v554_v56  }
 0x1df   : > { %635 = shalt.err (!%p632_p7)
}
 0x1e0   : > { %s636_s14 = scalar_lea.hbm %s789_s9, 128  ;;  %s640_s23 = scalar_lea.hbm %s836_s4, 512 }
 0x1e1   : > { %p637_p8 = scmp.ne.s32.totalorder %s789_s9, %s636_s14  ;;  %p641_p11 = scmp.lt.s32.totalorder %s789_s9, %s836_s4 }
 0x1e2   : > { %p642_p12 = scmp.lt.s32.totalorder %s640_s23, %s636_s14 }
 0x1e3   : > { %p638_p9 = pnand %p637_p8, %p754_p5 }
 0x1e4   : > { %p643_p13 = por %p642_p12, %p641_p11 }
 0x1e5   : > { %p639_p10 = pneg %p638_p9 }
 0x1e7   : > { %p644_p0 = pnand %p643_p13, %p639_p10 }
 0x1e9   : > { %647 = shalt.err (!%p644_p0)
}
 0x1ea   : > { %s690_s30 = smov 64  }
 0x1eb   : > { %564 = dma.vmem_to_hbm [thread:$0]  (%p754_p5), %s784_s5, 128, %s789_s9, %s791_s10, %s690_s30, %s690_s30, %s688_s27  }
 0x1ec PF: > { %p570_p1 = scmp.ge.s32.totalorder %s682_s18, 2  ;;  %s454_s6 = sand.u32 1, %s670_s15  }
 0x1ed   : > { %s455_s7 = scalar_lea.sflag [#allocation3], %s454_s6 }
 0x1ee   : > { %p567_p2 = pnand %p570_p1, %p758_p6 }
 0x1f0   : > { %p568_p3 = pneg %p567_p2 }
 0x1f2   : > { %665 = dma.done.wait (%p568_p3), %s455_s7, 128  }
 0x1f3   : > { %667 = vsyncadd (%p568_p3), %s455_s7, 4294967168  ;;  %p14_p4 = scmp.ge.s32.totalorder %s741_s21, 6   ;;  %s839_s15 = smov %s674_s16 }
 0x1f4   : > { %s840_s16 = smov %s678_s17  ;;  %s841_s17 = smov %s752_s24 }
 0x1f5   : > { %s842_s18 = smov %s741_s21  ;;  %16 = sbr.rel (!%p14_p4) target bundleno = 3 (0x3), region = 77 }
 0x1fa   :  { %460 = vsyncpa [#allocation3], 1 }
 0x1fb   :  { %462 = vsyncpa [#allocation3 + $0x1], 1 }

</bundles_post_ra>
